<compile_context>
chip_gen: v6e
topology: v6e:2x2x1
jax: 0.10.0
libtpu: 0.0.40
codegen_flags: <defaults>
</compile_context>

<pallas_src>
import jax
import jax.numpy as jnp
from jax.experimental import pallas as pl
from jax.experimental.pallas import tpu as pltpu


D_IN = 64          # hidden1 in_features
D_HID = 50         # hidden1 out_features (logical)
D_HID_PAD = 128    # lane-dense padded out_features
PAD_BIAS = -30.0   # padding-lane bias -> sigmoid saturates to ~0


def _round_up(n, m):
    return ((n + m - 1) // m) * m


def _sublane_granule(dtype):
    # f32 -> 8, bf16 -> 16, int8/fp8 -> 32 (packed sublanes).
    return 8 * (4 // jnp.dtype(dtype).itemsize)


def _pick_tile(b_pad, tb, granule):
    """Largest tile (multiple of granule, <= tb) dividing b_pad; prefers a
    grid of >=2 steps so the batch axis can shard across both v7x TCs."""
    t = max(granule, (min(tb, b_pad) // granule) * granule)
    if b_pad >= 2 * granule and t > b_pad // 2:
        t = max(granule, ((b_pad // 2) // granule) * granule)
    while t > granule and b_pad % t != 0:
        t -= granule
    return t


def _hidden1_sigmoid_kernel(x_ref, w_ref, b_ref, o_ref):
    # x_ref: (TB, 64) f32, w_ref: (64, 128) f32, b_ref: (1, 128) f32,
    # o_ref: (TB, 128) out_dtype.  Accumulate in f32, cast only at the store.
    y = jnp.dot(x_ref[...], w_ref[...], preferred_element_type=jnp.float32)
    o_ref[...] = jax.nn.sigmoid(y + b_ref[...]).astype(o_ref.dtype)


def pad_hidden1_params(w1, b1):
    """Precompute lane-dense (128-wide) padded weights/bias once.

    Padding weight columns are zero; padding bias lanes are -30 so the
    sigmoid output in lanes 50..127 saturates to ~0 and the padded output
    buffer is safe to feed into unmasked downstream reductions.
    """
    w1p = jnp.zeros((D_IN, D_HID_PAD), jnp.float32).at[:, :D_HID].set(w1)
    b1p = jnp.full((1, D_HID_PAD), PAD_BIAS, jnp.float32).at[0, :D_HID].set(b1)
    return w1p, b1p


def hidden1_sigmoid_padded(x, w1p, b1p, *, tb=2048, out_dtype=jnp.bfloat16):
    """Pallas hot path: sigmoid(x @ W1 + b1), batch-tiled, lane-dense output.

    x:   (B, 64) float32
    w1p: (64, 128) float32 (cols >= 50 are zero padding)
    b1p: (1, 128) float32  (lanes >= 50 hold -30)
    returns (B, 128) out_dtype; lanes 50..127 are ~0 (no lane slice on the
    hot path -- consumers use the first 50 lanes).
    """
    B, Din = x.shape
    assert Din == D_IN

    granule = _sublane_granule(out_dtype)
    B_pad = _round_up(B, granule)
    if B_pad != B:
        # Only for batch sizes not aligned to the sublane granule; aligned
        # batches (the common large-B case) take the copy-free path.
        x = jnp.pad(x, ((0, B_pad - B), (0, 0)))

    TB = _pick_tile(B_pad, tb, granule)
    grid = (B_pad // TB,)

    out_pad = pl.pallas_call(
        _hidden1_sigmoid_kernel,
        out_shape=jax.ShapeDtypeStruct((B_pad, D_HID_PAD), out_dtype),
        grid=grid,
        in_specs=[
            pl.BlockSpec((TB, Din), lambda i: (i, 0)),          # x tile
            pl.BlockSpec((Din, D_HID_PAD), lambda i: (0, 0)),   # W resident
            pl.BlockSpec((1, D_HID_PAD), lambda i: (0, 0)),     # b resident
        ],
        out_specs=pl.BlockSpec((TB, D_HID_PAD), lambda i: (i, 0)),
        compiler_params=pltpu.CompilerParams(
            dimension_semantics=("parallel",)),
    )(x, w1p, b1p)

    return out_pad if B_pad == B else out_pad[:B]


def hidden1_sigmoid(x, w1, b1, *, tb=2048, out_dtype=jnp.bfloat16,
                    min_pallas_rows=1024):
    """Convenience wrapper taking unpadded (64,50)/(50,) params.

    Returns (B, 50).  For small batches the fixed Pallas dispatch/grid costs
    dominate, so it falls back to plain XLA (which can fuse with neighbors).
    """
    B = x.shape[0]
    if B < min_pallas_rows:
        return jax.nn.sigmoid(x @ w1 + b1).astype(out_dtype)
    w1p, b1p = pad_hidden1_params(w1, b1)
    return hidden1_sigmoid_padded(x, w1p, b1p, tb=tb,
                                  out_dtype=out_dtype)[:, :D_HID]


def v_network_forward(x, params):
    """Full forward pass matching the PyTorch V_Network module.

    hidden2 is Linear(50, 0): its output is an empty (B, 0) array regardless
    of the hidden activations, so the hidden layer is dead code here and we
    return the empty result directly (semantically identical, avoids the
    wasted matmul/sigmoid/HBM round-trip).
    """
    del params
    B = x.shape[0]
    # TODO(synk): zero-width Linear(50, 0) has no compute to express in a kernel.
    return jnp.zeros((B, 0), jnp.float32)


def init_params(key):
    """Deterministic init mirroring torch.nn.Linear's uniform(-1/sqrt(fan_in))."""
    k1, k2 = jax.random.split(key, 2)
    bound1 = 1.0 / jnp.sqrt(64.0)
    w1 = jax.random.uniform(k1, (D_IN, D_HID), jnp.float32, -bound1, bound1)
    b1 = jax.random.uniform(k2, (D_HID,), jnp.float32, -bound1, bound1)
    # hidden2: Linear(50, 0) -> weight stored transposed (50, 0), bias (0,).
    w2 = jnp.zeros((D_HID, 0), jnp.float32)
    b2 = jnp.zeros((0,), jnp.float32)
    return (w1, b1, w2, b2)


if __name__ == "__main__":
    key = jax.random.PRNGKey(0)
    pkey, xkey = jax.random.split(key)
    params = init_params(pkey)
    w1, b1, _, _ = params

    B = 2
    x = jax.random.normal(xkey, (B, D_IN), jnp.float32)

    # Pure-JAX reference for the hidden layer.
    h_ref = jax.nn.sigmoid(x @ w1 + b1)

    # Padded params precomputed once, outside the per-call path.
    w1p, b1p = pad_hidden1_params(w1, b1)

    # Pallas kernel, default bf16 output path.
    h_bf16 = jax.block_until_ready(hidden1_sigmoid_padded(x, w1p, b1p))
    assert h_bf16.shape == (B, D_HID_PAD), h_bf16.shape
    assert h_bf16.dtype == jnp.bfloat16, h_bf16.dtype
    assert jnp.allclose(h_bf16[:, :D_HID].astype(jnp.float32), h_ref,
                        atol=1e-2, rtol=1e-2)
    # Padding lanes saturate to ~0 thanks to the -30 bias padding.
    assert jnp.max(jnp.abs(h_bf16[:, D_HID:].astype(jnp.float32))) < 1e-6

    # Pallas kernel, f32 output path (tight tolerance).
    h_f32 = jax.block_until_ready(
        hidden1_sigmoid_padded(x, w1p, b1p, out_dtype=jnp.float32))
    assert h_f32.shape == (B, D_HID_PAD), h_f32.shape
    assert jnp.allclose(h_f32[:, :D_HID], h_ref, atol=1e-5, rtol=1e-5)
    assert jnp.max(jnp.abs(h_f32[:, D_HID:])) < 1e-6

    # Convenience wrapper (small B -> XLA fallback path).
    h_small = jax.block_until_ready(hidden1_sigmoid(x, w1, b1))
    assert h_small.shape == (B, D_HID), h_small.shape
    assert jnp.allclose(h_small.astype(jnp.float32), h_ref,
                        atol=1e-2, rtol=1e-2)

    # Full module forward: output of Linear(50, 0) is an empty (B, 0) array.
    out = jax.block_until_ready(v_network_forward(x, params))
    assert out.shape == (B, 0), out.shape
    assert out.dtype == jnp.float32, out.dtype

    print("KERNEL_OK")
</pallas_src>

<mosaic_0001>
module attributes {stable_mosaic.version = 11 : i64} {
  func.func @_hidden1_sigmoid_kernel(%arg0: i32, %arg1: memref<16x64xf32, #tpu.memory_space<vmem>>, %arg2: memref<64x128xf32, #tpu.memory_space<vmem>>, %arg3: memref<1x128xf32, #tpu.memory_space<vmem>>, %arg4: memref<16x128xbf16, #tpu.memory_space<vmem>>) attributes {dimension_semantics = [#tpu.dimension_semantics<parallel>], iteration_bounds = array<i64: 1>, scalar_prefetch = 0 : i64, scratch_operands = 0 : i64, tpu.core_type = #tpu.core_type<tc>, window_params = [{transform_indices = @transform_0, window_bounds = array<i64: 16, 64>}, {pipeline_mode = #tpu.pipeline_mode<synchronous>, transform_indices = @transform_1, window_bounds = array<i64: 64, 128>}, {pipeline_mode = #tpu.pipeline_mode<synchronous>, transform_indices = @transform_2, window_bounds = array<i64: 1, 128>}, {transform_indices = @transform_3, window_bounds = array<i64: 16, 128>}]} {
    %c0 = arith.constant 0 : index
    %c0_0 = arith.constant 0 : index
    %0 = vector.load %arg1[%c0, %c0_0] : memref<16x64xf32, #tpu.memory_space<vmem>>, vector<16x64xf32>
    %c0_1 = arith.constant 0 : index
    %c0_2 = arith.constant 0 : index
    %1 = vector.load %arg2[%c0_1, %c0_2] : memref<64x128xf32, #tpu.memory_space<vmem>>, vector<64x128xf32>
    %cst = arith.constant dense<0.000000e+00> : vector<16x128xf32>
    %2 = tpu.matmul %0, %1, %cst {dimension_numbers = #tpu.dot_dimension_numbers<[1], [0], [0], [1], [0, 0, 1, 1], [], []>} : vector<16x64xf32>, vector<64x128xf32>, vector<16x128xf32> -> vector<16x128xf32>
    %c0_3 = arith.constant 0 : index
    %c0_4 = arith.constant 0 : index
    %3 = vector.load %arg3[%c0_3, %c0_4] : memref<1x128xf32, #tpu.memory_space<vmem>>, vector<1x128xf32>
    %4 = vector.broadcast %3 : vector<1x128xf32> to vector<16x128xf32>
    %5 = arith.addf %2, %4 : vector<16x128xf32>
    %6 = arith.negf %5 : vector<16x128xf32>
    %7 = math.exp %6 : vector<16x128xf32>
    %cst_5 = arith.constant 1.000000e+00 : f32
    %8 = vector.broadcast %cst_5 : f32 to vector<16x128xf32>
    %9 = arith.addf %8, %7 : vector<16x128xf32>
    %10 = arith.divf %8, %9 : vector<16x128xf32>
    %11 = arith.truncf %10 : vector<16x128xf32> to vector<16x128xbf16>
    %c0_6 = arith.constant 0 : index
    %c0_7 = arith.constant 0 : index
    %12 = vector.load %arg4[%c0_6, %c0_7] : memref<16x128xbf16, #tpu.memory_space<vmem>>, vector<16x128xbf16>
    tpu.vector_store %arg4[%c0_6, %c0_7], %11 {strides = array<i32>} : memref<16x128xbf16, #tpu.memory_space<vmem>>, vector<16x128xbf16>,
    return
  }
  func.func @transform_0(%arg0: i32) -> (i32, i32) {
    %c0_i32 = arith.constant 0 : i32
    %c0_i32_0 = arith.constant 0 : i32
    return %arg0, %c0_i32 : i32, i32
  }
  func.func @transform_1(%arg0: i32) -> (i32, i32) {
    %c0_i32 = arith.constant 0 : i32
    %c0_i32_0 = arith.constant 0 : i32
    %c0_i32_1 = arith.constant 0 : i32
    return %c0_i32, %c0_i32_0 : i32, i32
  }
  func.func @transform_2(%arg0: i32) -> (i32, i32) {
    %c0_i32 = arith.constant 0 : i32
    %c0_i32_0 = arith.constant 0 : i32
    %c0_i32_1 = arith.constant 0 : i32
    return %c0_i32, %c0_i32_0 : i32, i32
  }
  func.func @transform_3(%arg0: i32) -> (i32, i32) {
    %c0_i32 = arith.constant 0 : i32
    %c0_i32_0 = arith.constant 0 : i32
    return %arg0, %c0_i32 : i32, i32
  }
}

</mosaic_0001>

<bundles_post_ra>
// kernel: tpu_custom_call.1
= control target key start
LH: loop header
LB: loop body
LE: loop exit
PB: predicated region body
PF: predicated region fallthrough
CT: control target
= control target key end

     0   :  { %8 = vsyncpa [#allocation3], 0  ;;  %s347_s0 = inlined_call_operand.hbm [shape: f32[16,64], index: 0, kind: input, shape index: {}]   ;;  %s348_s1 = inlined_call_operand.hbm [shape: f32[64,128], index: 1, kind: input, shape index: {}]   ;;  %s349_s2 = inlined_call_operand.vmem [shape: f32[1,128], index: 2, kind: input, shape index: {}]   ;;  %s350_s3 = inlined_call_operand.hbm [shape: bf16[16,128], index: 3, kind: output, shape index: {}]  }
   0x1   :  { %9 = vsyncpa [#allocation6], 0 }
   0x2   :  { %10 = vsyncpa [#allocation4], 0  ;;  %s306_s12 = smov [#allocation2]  }
   0x3   :  { %s16_s13 = sshll.u32 %s306_s12, 4  ;;  %s17_s13 = int_to_ptr.vmem [resolvable:$true] %s16_s13 }
   0x4   :  { %s248_s14 = scalar_lea.vmem %s17_s13, 256  ;;  %p253_p1 = scmp.lt.s32.totalorder %s17_s13, %s17_s13 }
   0x5   :  { %p249_p0 = scmp.ne.s32.totalorder %s17_s13, %s248_s14  ;;  %p254_p2 = scmp.lt.s32.totalorder %s248_s14, %s248_s14 }
   0x7   :  { %p255_p3 = por %p254_p2, %p253_p1 }
   0x9   :  { %p256_p4 = pnand %p255_p3, %p249_p0 }
   0xb   :  { %259 = shalt.err (!%p256_p4)
}
   0xc   :  { %s307_s15 = smov 128   ;;  %s308_s16 = smov 8  }
   0xd   :  { %22 = dma.hbm_to_vmem [thread:$0]  %s347_s0, 256, %s17_s13, [#allocation3], %s307_s15, %s307_s15, %s308_s16  }
   0xe   :  { %s309_s19 = smov [#allocation5]  }
   0xf   :  { %s28_s20 = sshll.u32 %s309_s19, 4  ;;  %s29_s20 = int_to_ptr.vmem [resolvable:$true] %s28_s20 }
  0x10   :  { %s268_s21 = scalar_lea.vmem %s29_s20, 1024  ;;  %p273_p6 = scmp.lt.s32.totalorder %s29_s20, %s29_s20 }
  0x11   :  { %p269_p5 = scmp.ne.s32.totalorder %s29_s20, %s268_s21  ;;  %p274_p7 = scmp.lt.s32.totalorder %s268_s21, %s268_s21 }
  0x13   :  { %p275_p8 = por %p274_p7, %p273_p6 }
  0x15   :  { %p276_p9 = pnand %p275_p8, %p269_p5 }
  0x17   :  { %279 = shalt.err (!%p276_p9)
}
  0x18   :  { %34 = dma.hbm_to_vmem [thread:$0]  %s348_s1, 1024, %s29_s20, [#allocation6], %s307_s15, %s307_s15, %s308_s16  }
  0x19   :  { %300 = dma.done.wait [#allocation3], 256  }
  0x1a   :  { %301 = vsyncadd [#allocation3], 4294967040 }
  0x1b   :  { %302 = dma.done.wait [#allocation6], 1024  }
  0x1c   :  { %303 = vsyncadd [#allocation6], 4294966272  ;;  %v52_v0 = vld [vmem:[#allocation5 + $0x38] sm:$0xff]  ;;  %v51_v1 = vld [vmem:[#allocation5 + $0x30] sm:$0xff]  ;;  %vm60_vm0 = vcmask 523264   ;;  %s310_s24 = smov [#allocation7]  }
  0x1d   :  { %206 = vmatprep.subr.mxu0 %v52_v0  ;;  %v50_v2 = vld [vmem:[#allocation5 + $0x28] sm:$0xff]  ;;  %v43_v3 = vld [vmem:[#allocation2] sm:$0xff]  ;;  %v49_v4 = vld [vmem:[#allocation5 + $0x20] sm:$0xff]  ;;  %s169_s25 = sshll.u32 %s310_s24, 4  ;;  %s170_s25 = int_to_ptr.vmem [resolvable:$true] %s169_s25 }
  0x1e   :  { %207 = vmatpush3.msra.mxu0 %v52_v0  ;;  %222 = vmatprep.mubr.msk.f32.mxu0 %vm60_vm0, %v43_v3  ;;  %v48_v5 = vld [vmem:[#allocation5 + $0x18] sm:$0xff]  ;;  %v47_v6 = vld [vmem:[#allocation5 + $0x10] sm:$0xff]  ;;  %v46_v7 = vld [vmem:[#allocation5 + $0x8] sm:$0xff]  ;;  %p285_p11 = scmp.lt.s32.totalorder %s170_s25, %s170_s25 }
  0x1f   :  { %208 = vmatprep.subr.mxu0 %v51_v1  ;;  %v45_v8 = vld [vmem:[#allocation5] sm:$0xff]  ;;  %v44_v9 = vld [vmem:[#allocation2 + $0x8] sm:$0xff]  ;;  %v182_v10 = vld [vmem:[%s349_s2] ss:$0 sm:$0xff]  ;;  %s280_s2 = scalar_lea.vmem %s170_s25, 128 }
  0x20   :  { %209 = vmatpush3.msra.mxu0 %v51_v1  ;;  %p281_p10 = scmp.ne.s32.totalorder %s170_s25, %s280_s2  ;;  %p286_p12 = scmp.lt.s32.totalorder %s280_s2, %s280_s2 }
  0x21   :  { %210 = vmatprep.subr.mxu0 %v50_v2 }
  0x22   :  { %211 = vmatpush3.msra.mxu0 %v50_v2  ;;  %p287_p13 = por %p286_p12, %p285_p11 }
  0x23   :  { %212 = vmatprep.subr.mxu0 %v49_v4 }
  0x24   :  { %213 = vmatpush3.msra.mxu0 %v49_v4  ;;  %p288_p0 = pnand %p287_p13, %p281_p10 }
  0x25   :  { %214 = vmatprep.subr.mxu0 %v48_v5 }
  0x26   :  { %215 = vmatpush3.msra.mxu0 %v48_v5 }
  0x27   :  { %216 = vmatprep.subr.mxu0 %v47_v6 }
  0x28   :  { %217 = vmatpush3.msra.mxu0 %v47_v6 }
  0x29   :  { %218 = vmatprep.subr.mxu0 %v46_v7 }
  0x2a   :  { %219 = vmatpush3.msra.mxu0 %v46_v7 }
  0x2b   :  { %220 = vmatprep.subr.mxu0 %v45_v8 }
  0x2c   :  { %221 = vmatpush3.msra.mxu0 %v45_v8 }
  0x2d   :  { %223 = vmatmul.mubr.msk.f32.vlgmr.msra.gmra.mxu0 %vm60_vm0, %v44_v9 }
  0xed   :  { %v224_v11 = vpop.f32.mrf.mxu0 }
  0xee   :  { %v139_v12 = vadd.f32 %v224_v11, %v182_v10 }
  0xef   :  { %v133_v13 = vpop.f32.mrf.mxu0 }
  0xf0   :  { %v186_v14 = vmul.f32 -1.442695, %v139_v12  ;;  %v134_v15 = vadd.f32 %v182_v10, %v133_v13 }
  0xf2   :  { %232 = vpow2.f32 %v186_v14  ;;  %v185_v16 = vmul.f32 -1.442695, %v134_v15 }
  0xf4   :  { %234 = vpow2.f32 %v185_v16 }
  0xff   :  { %v233_v17 = vpop.eup %232 }
 0x100   :  { %v149_v18 = vadd.f32 1.0, %v233_v17 }
 0x101   :  { %v235_v19 = vpop.eup %234 }
 0x102   :  { %v148_v20 = vadd.f32 1.0, %v235_v19  ;;  %236 = vrcp.f32 %v149_v18 }
 0x104   :  { %238 = vrcp.f32 %v148_v20 }
 0x10f   :  { %v237_v21 = vpop.eup %236 }
 0x111   :  { %v239_v22 = vpop.eup %238 }
 0x112   :  { %v194_v23 = vpack.c.bf16 %v237_v21, %v239_v22 }
 0x114   :  { %195 = vst [vmem:[#allocation7] sm:$0xff] %v194_v23  }
 0x115   :  { %291 = shalt.err (!%p288_p0)
}
 0x116   :  { %s311_s26 = smov 64   ;;  %s312_s27 = smov 4  }
 0x117   :  { %175 = dma.vmem_to_hbm [thread:$0]  %s170_s25, 128, %s350_s3, [#allocation4], %s311_s26, %s311_s26, %s312_s27  }
 0x118   :  { %304 = dma.done.wait [#allocation4], 128  }
 0x119   :  { %305 = vsyncadd [#allocation4], 4294967168 }
 0x11a   :  { %179 = vsyncpa [#allocation3], 1 }
 0x11b   :  { %180 = vsyncpa [#allocation6], 1 }
 0x11c   :  { %181 = vsyncpa [#allocation4], 1 }

</bundles_post_ra>
